<compile_context>
chip_gen: v7x
topology: tpu7x:2x2x1
jax: 0.10.0
libtpu: 0.0.40
codegen_flags: <defaults>
</compile_context>

<pallas_src>
import functools

import jax
import jax.numpy as jnp
from jax.experimental import pallas as pl
from jax.experimental.pallas import tpu as pltpu


def _ceil_to(x, m):
    return ((x + m - 1) // m) * m


def _choose_tile(dim, pref, align):
    """Pick a block size for one matmul dimension.

    Returns (tile, padded_dim). Prefers: full dim when small (always legal,
    no pad); else the largest multiple-of-`align` divisor of dim <= pref
    (no pad); else pads dim up to a multiple of a pref-sized tile.
    """
    if dim <= pref:
        return dim, dim                      # full-extent block: always legal
    t = (pref // align) * align
    while t >= align:
        if dim % t == 0:
            return t, dim
        t -= align
    t = (pref // align) * align
    return t, _ceil_to(dim, t)


# ----------------------------------------------------------------------------
# Kernel 1: tiled dense linear  y = x @ W  (+ b),  W already stored as (K, O)
#   grid = (M/tm, O/tn, K/tk), fp32 VMEM accumulator, K is the reduction axis.
# ----------------------------------------------------------------------------
def _linear_bias_kernel(x_ref, w_ref, b_ref, o_ref, acc_ref):
    @pl.when(pl.program_id(2) == 0)
    def _init():
        acc_ref[...] = jnp.zeros(acc_ref.shape, acc_ref.dtype)

    acc_ref[...] += jnp.dot(x_ref[...], w_ref[...],
                            preferred_element_type=jnp.float32)

    @pl.when(pl.program_id(2) == pl.num_programs(2) - 1)
    def _finalize():
        o_ref[...] = (acc_ref[...] +
                      b_ref[...].astype(jnp.float32)).astype(o_ref.dtype)


def _linear_nobias_kernel(x_ref, w_ref, o_ref, acc_ref):
    @pl.when(pl.program_id(2) == 0)
    def _init():
        acc_ref[...] = jnp.zeros(acc_ref.shape, acc_ref.dtype)

    acc_ref[...] += jnp.dot(x_ref[...], w_ref[...],
                            preferred_element_type=jnp.float32)

    @pl.when(pl.program_id(2) == pl.num_programs(2) - 1)
    def _finalize():
        o_ref[...] = acc_ref[...].astype(o_ref.dtype)


def pallas_linear(x2d, w_t, bias=None, *, tm=512, tn=512, tk=1024):
    """x2d: (M, K), w_t: (K, O) pre-transposed, bias: (O,) or None -> (M, O)."""
    M, K = x2d.shape
    K2, O = w_t.shape
    assert K == K2
    out_dtype = x2d.dtype

    tm, Mp = _choose_tile(M, tm, 8)
    tk, Kp = _choose_tile(K, tk, 128)
    tn, Op = _choose_tile(O, tn, 128)

    xp = x2d if (Mp, Kp) == (M, K) else jnp.pad(x2d, ((0, Mp - M), (0, Kp - K)))
    wp = w_t if (Kp, Op) == (K, O) else jnp.pad(w_t, ((0, Kp - K), (0, Op - O)))

    in_specs = [
        pl.BlockSpec((tm, tk), lambda i, j, k: (i, k)),
        pl.BlockSpec((tk, tn), lambda i, j, k: (k, j)),
    ]
    inputs = [xp, wp]
    if bias is not None:
        bp = bias if Op == O else jnp.pad(bias, (0, Op - O))
        inputs.append(bp.reshape(1, Op))
        in_specs.append(pl.BlockSpec((1, tn), lambda i, j, k: (0, j)))
        kernel = _linear_bias_kernel
    else:
        kernel = _linear_nobias_kernel

    out = pl.pallas_call(
        kernel,
        out_shape=jax.ShapeDtypeStruct((Mp, Op), out_dtype),
        grid_spec=pltpu.PrefetchScalarGridSpec(
            num_scalar_prefetch=0,
            grid=(Mp // tm, Op // tn, Kp // tk),
            in_specs=in_specs,
            out_specs=pl.BlockSpec((tm, tn), lambda i, j, k: (i, j)),
            scratch_shapes=[pltpu.VMEM((tm, tn), jnp.float32)],
        ),
        compiler_params=pltpu.CompilerParams(
            dimension_semantics=("parallel", "parallel", "arbitrary")),
    )(*inputs)

    if (Mp, Op) != (M, O):
        out = out[:M, :O]
    return out


# ----------------------------------------------------------------------------
# Kernel 2: flash-style multi-head attention over lane-aligned head groups
#   grid = (B, G, Nq/tq, Nkv/tkv); kv axis is the reduction axis.
# ----------------------------------------------------------------------------
def _heads_per_group(num_heads, head_dim):
    if head_dim % 128 == 0:
        return 1                               # each head already lane-aligned
    if 128 % head_dim == 0:
        g = 128 // head_dim                    # pack heads into 128-lane groups
        if g <= num_heads and num_heads % g == 0:
            return g
    return num_heads                           # fall back: whole A as one group


def _attn_seq_tiling(N, tq_pref=128, tkv_pref=256):
    """Returns (tq, tkv, padded_N). Small N -> single full-extent tile."""
    if N <= tq_pref:
        return N, N, N
    tq = tq_pref
    tkv = tkv_pref if N > tkv_pref else tq_pref
    Np = _ceil_to(N, max(tq, tkv))
    return tq, tkv, Np


def _flash_attn_kernel(q_ref, k_ref, v_ref, o_ref, m_ref, l_ref, acc_ref,
                       *, heads_per_group, head_dim, kv_valid, needs_mask):
    ki = pl.program_id(3)
    nk = pl.num_programs(3)

    @pl.when(ki == 0)
    def _init():
        m_ref[...] = jnp.full(m_ref.shape, -1e30, m_ref.dtype)
        l_ref[...] = jnp.zeros(l_ref.shape, l_ref.dtype)
        acc_ref[...] = jnp.zeros(acc_ref.shape, acc_ref.dtype)

    q_g = q_ref[0]                     # (tq,  gw) native dtype, lane-dense
    k_g = k_ref[0]                     # (tkv, gw)
    v_g = v_ref[0]                     # (tkv, gw)
    tq, tkv = q_g.shape[0], k_g.shape[0]

    if needs_mask:                     # static: only when N was padded
        col = jax.lax.broadcasted_iota(jnp.int32, (tq, tkv), 1) + ki * tkv
        kv_mask = col < kv_valid

    # Small static unroll over the heads of this lane group (typically 1-2).
    for h in range(heads_per_group):
        lo = h * head_dim
        q_h = q_g[:, lo:lo + head_dim]
        k_h = k_g[:, lo:lo + head_dim]
        v_h = v_g[:, lo:lo + head_dim]

        # scale is folded into wq at init -> plain QK^T here
        s = jax.lax.dot_general(q_h, k_h, (((1,), (1,)), ((), ())),
                                preferred_element_type=jnp.float32)  # (tq,tkv)
        if needs_mask:
            s = jnp.where(kv_mask, s, -1e30)

        # 128-lane-wide running stats: full, unmasked loads/stores.
        m_prev = m_ref[h]                                   # (tq, 128)
        l_prev = l_ref[h]                                   # (tq, 128)
        m_next = jnp.maximum(m_prev, jnp.max(s, axis=-1, keepdims=True))
        alpha = jnp.exp(m_prev[:, 0:1] - m_next[:, 0:1])    # (tq, 1)
        p = jnp.exp(s - m_next[:, 0:1])                     # (tq, tkv) fp32

        l_ref[h] = alpha * l_prev + jnp.sum(p, axis=-1, keepdims=True)
        m_ref[h] = m_next

        pv = jnp.dot(p.astype(v_h.dtype), v_h,
                     preferred_element_type=jnp.float32)    # (tq, hd) fp32
        acc_ref[h] = acc_ref[h] * alpha + pv                # full-array RMW

    @pl.when(ki == nk - 1)
    def _finalize():
        for h in range(heads_per_group):
            lo = h * head_dim
            inv_l = pl.reciprocal(l_ref[h][:, 0:1], approx=False)
            o_ref[0, :, lo:lo + head_dim] = (acc_ref[h] * inv_l).astype(o_ref.dtype)


def pallas_attention_fused(qkv, num_heads, head_dim, *,
                           tq_pref=128, tkv_pref=256):
    """qkv: (B, N, 3*A) fused projections (q already scaled) -> (B, N, A)."""
    B, N, threeA = qkv.shape
    A = num_heads * head_dim
    assert threeA == 3 * A

    hpg = _heads_per_group(num_heads, head_dim)
    gw = hpg * head_dim                       # lane width of one head group
    G = num_heads // hpg                      # number of head groups

    tq, tkv, Np = _attn_seq_tiling(N, tq_pref, tkv_pref)
    needs_mask = (Np != N)
    if needs_mask:
        qkv = jnp.pad(qkv, ((0, 0), (0, Np - N), (0, 0)))

    if gw % 128 == 0:
        # Lane-aligned groups: read q/k/v straight out of the fused array via
        # last-axis block offsets (no HBM split copies).
        q_in = k_in = v_in = qkv
        q_off, k_off, v_off = 0, G, 2 * G
    else:
        # Odd / tiny all_head_dim: gw == A here; split once on the host so the
        # kernel blocks cover the full last dim (always a legal block shape).
        q_in = qkv[:, :, 0:A]
        k_in = qkv[:, :, A:2 * A]
        v_in = qkv[:, :, 2 * A:3 * A]
        q_off = k_off = v_off = 0

    q_spec = pl.BlockSpec((1, tq, gw), lambda b, g, qi, ki: (b, qi, q_off + g))
    k_spec = pl.BlockSpec((1, tkv, gw), lambda b, g, qi, ki: (b, ki, k_off + g))
    v_spec = pl.BlockSpec((1, tkv, gw), lambda b, g, qi, ki: (b, ki, v_off + g))
    o_spec = pl.BlockSpec((1, tq, gw), lambda b, g, qi, ki: (b, qi, g))

    out = pl.pallas_call(
        functools.partial(_flash_attn_kernel, heads_per_group=hpg,
                          head_dim=head_dim, kv_valid=N, needs_mask=needs_mask),
        out_shape=jax.ShapeDtypeStruct((B, Np, A), qkv.dtype),
        grid_spec=pltpu.PrefetchScalarGridSpec(
            num_scalar_prefetch=0,
            grid=(B, G, Np // tq, Np // tkv),
            in_specs=[q_spec, k_spec, v_spec],
            out_specs=o_spec,
            scratch_shapes=[
                pltpu.VMEM((hpg, tq, 128), jnp.float32),       # running max m
                pltpu.VMEM((hpg, tq, 128), jnp.float32),       # running sum l
                pltpu.VMEM((hpg, tq, head_dim), jnp.float32),  # fp32 acc
            ],
        ),
        compiler_params=pltpu.CompilerParams(
            dimension_semantics=("parallel", "parallel", "parallel",
                                 "arbitrary")),
    )(q_in, k_in, v_in)

    if needs_mask:
        out = out[:, :N, :]
    return out


# ----------------------------------------------------------------------------
# Module-equivalent wrapper
# ----------------------------------------------------------------------------
class AttentionPallas:
    def __init__(self, dim, num_heads=8, qkv_bias=False, qk_scale=None,
                 attn_head_dim=None, key=None, dtype=jnp.float32):
        self.num_heads = num_heads
        head_dim = dim // num_heads
        if attn_head_dim is not None:
            head_dim = attn_head_dim
        self.head_dim = head_dim
        all_head_dim = head_dim * num_heads
        self.all_head_dim = all_head_dim
        self.dim = dim
        self.scale = qk_scale if qk_scale is not None else head_dim ** (-0.5)

        key = jax.random.PRNGKey(42) if key is None else key
        k1, k2, k3, k4 = jax.random.split(key, 4)
        # deterministic synthetic weights (same shapes as the nn.Linear params)
        self.qkv_weight = (jax.random.normal(k1, (all_head_dim * 3, dim), dtype)
                           * 0.02)
        self.qkv_bias = (jax.random.normal(k2, (all_head_dim * 3,), dtype) * 0.02
                         if qkv_bias else None)
        self.proj_weight = jax.random.normal(k3, (dim, all_head_dim), dtype) * 0.02
        self.proj_bias = jax.random.normal(k4, (dim,), dtype) * 0.02

        # --- derived kernel parameters (all free, done once at init) ---------
        A = all_head_dim
        # fold the softmax scale into the q rows of the fused qkv weight/bias
        fused_w = jnp.concatenate(
            [self.qkv_weight[0:A] * self.scale, self.qkv_weight[A:]], axis=0)
        self.qkv_w_t = jnp.transpose(fused_w)            # (C, 3A) pre-transposed
        if self.qkv_bias is not None:
            self.qkv_b_fused = jnp.concatenate(
                [self.qkv_bias[0:A] * self.scale, self.qkv_bias[A:]])
        else:
            self.qkv_b_fused = None
        self.proj_w_t = jnp.transpose(self.proj_weight)  # (A, dim) pre-transposed

    def __call__(self, x):
        # x: (N, B, C) seq-first, as fed to the PyTorch module
        x = jnp.transpose(x, (1, 0, 2))          # (B, N, C)
        B, N, C = x.shape
        A = self.all_head_dim

        x2d = x.reshape(B * N, C)
        # fused q/k/v projection: one tiled Pallas matmul, x read from HBM once
        qkv = pallas_linear(x2d, self.qkv_w_t, self.qkv_b_fused)   # (B*N, 3A)
        qkv = qkv.reshape(B, N, 3 * A)

        # flash-style attention (attn_drop is identity, p=0)
        o = pallas_attention_fused(qkv, self.num_heads, self.head_dim)  # (B,N,A)

        # output projection (proj_drop is identity, p=0)
        out = pallas_linear(o.reshape(B * N, A), self.proj_w_t, self.proj_bias)
        out = out.reshape(B, N, self.dim)
        return jnp.transpose(out, (1, 0, 2))      # back to (N, B, C)


# ----------------------------------------------------------------------------
# Pure-JAX reference (for sanity check)
# ----------------------------------------------------------------------------
def reference(module: AttentionPallas, x):
    x = jnp.transpose(x, (1, 0, 2))
    B, N, C = x.shape
    H, hd = module.num_heads, module.head_dim
    qkv = x @ module.qkv_weight.T
    if module.qkv_bias is not None:
        qkv = qkv + module.qkv_bias
    qkv = qkv.reshape(B, N, 3, H, hd).transpose(2, 0, 3, 1, 4)
    q, k, v = qkv[0] * module.scale, qkv[1], qkv[2]
    attn = jnp.einsum("bhqd,bhkd->bhqk", q, k)
    attn = jax.nn.softmax(attn, axis=-1)
    o = jnp.einsum("bhqk,bhkd->bhqd", attn, v)
    o = o.transpose(0, 2, 1, 3).reshape(B, N, H * hd)
    o = o @ module.proj_weight.T + module.proj_bias
    return jnp.transpose(o, (1, 0, 2))


if __name__ == "__main__":
    # small shapes: seq N=8, batch B=2, dim=32, heads=4 -> head_dim=8
    N, B, C = 8, 2, 32
    x = jax.random.normal(jax.random.PRNGKey(0), (N, B, C), jnp.float32)

    mod = AttentionPallas(dim=C, num_heads=4, qkv_bias=True,
                          key=jax.random.PRNGKey(1))

    out = jax.block_until_ready(mod(x))
    ref = jax.block_until_ready(reference(mod, x))

    assert out.shape == (N, B, C), out.shape
    max_err = float(jnp.max(jnp.abs(out - ref)))
    assert jnp.allclose(out, ref, atol=1e-3, rtol=1e-3), max_err
    print("KERNEL_OK")
</pallas_src>

<mosaic_0001>
module attributes {stable_mosaic.version = 11 : i64} {
  func.func @_linear_bias_kernel(%arg0: i32, %arg1: i32, %arg2: i32, %arg3: memref<16x32xf32, #tpu.memory_space<vmem>>, %arg4: memref<32x96xf32, #tpu.memory_space<vmem>>, %arg5: memref<1x96xf32, #tpu.memory_space<vmem>>, %arg6: memref<16x96xf32, #tpu.memory_space<vmem>>, %arg7: memref<16x96xf32, #tpu.memory_space<vmem>>) attributes {dimension_semantics = [#tpu.dimension_semantics<parallel>, #tpu.dimension_semantics<parallel>, #tpu.dimension_semantics<arbitrary>], iteration_bounds = array<i64: 1, 1, 1>, scalar_prefetch = 0 : i64, scratch_operands = 1 : i64, tpu.core_type = #tpu.core_type<tc>, window_params = [{transform_indices = @transform_0, window_bounds = array<i64: 16, 32>}, {transform_indices = @transform_1, window_bounds = array<i64: 32, 96>}, {transform_indices = @transform_2, window_bounds = array<i64: 1, 96>}, {transform_indices = @transform_3, window_bounds = array<i64: 16, 96>}]} {
    %c0_i32 = arith.constant 0 : i32
    %0 = arith.cmpi eq, %arg2, %c0_i32 : i32
    %1 = arith.extui %0 : i1 to i32
    %c0_i32_0 = arith.constant 0 : i32
    %2 = arith.cmpi ne, %1, %c0_i32_0 : i32
    scf.if %2 {
      %cst_10 = arith.constant 0.000000e+00 : f32
      %12 = vector.broadcast %cst_10 : f32 to vector<16x96xf32>
      %c0_11 = arith.constant 0 : index
      %c0_12 = arith.constant 0 : index
      %13 = vector.load %arg7[%c0_11, %c0_12] : memref<16x96xf32, #tpu.memory_space<vmem>>, vector<16x96xf32>
      tpu.vector_store %arg7[%c0_11, %c0_12], %12 {strides = array<i32>} : memref<16x96xf32, #tpu.memory_space<vmem>>, vector<16x96xf32>,
    } else {
    }
    %c0 = arith.constant 0 : index
    %c0_1 = arith.constant 0 : index
    %3 = vector.load %arg7[%c0, %c0_1] : memref<16x96xf32, #tpu.memory_space<vmem>>, vector<16x96xf32>
    %c0_2 = arith.constant 0 : index
    %c0_3 = arith.constant 0 : index
    %4 = vector.load %arg3[%c0_2, %c0_3] : memref<16x32xf32, #tpu.memory_space<vmem>>, vector<16x32xf32>
    %c0_4 = arith.constant 0 : index
    %c0_5 = arith.constant 0 : index
    %5 = vector.load %arg4[%c0_4, %c0_5] : memref<32x96xf32, #tpu.memory_space<vmem>>, vector<32x96xf32>
    %cst = arith.constant dense<0.000000e+00> : vector<16x96xf32>
    %6 = tpu.matmul %4, %5, %cst {dimension_numbers = #tpu.dot_dimension_numbers<[1], [0], [0], [1], [0, 0, 1, 1], [], []>} : vector<16x32xf32>, vector<32x96xf32>, vector<16x96xf32> -> vector<16x96xf32>
    %7 = arith.addf %3, %6 : vector<16x96xf32>
    %c0_6 = arith.constant 0 : index
    %c0_7 = arith.constant 0 : index
    %8 = vector.load %arg7[%c0_6, %c0_7] : memref<16x96xf32, #tpu.memory_space<vmem>>, vector<16x96xf32>
    tpu.vector_store %arg7[%c0_6, %c0_7], %7 {strides = array<i32>} : memref<16x96xf32, #tpu.memory_space<vmem>>, vector<16x96xf32>,
    %c0_i32_8 = arith.constant 0 : i32
    %9 = arith.cmpi eq, %arg2, %c0_i32_8 : i32
    %10 = arith.extui %9 : i1 to i32
    %c0_i32_9 = arith.constant 0 : i32
    %11 = arith.cmpi ne, %10, %c0_i32_9 : i32
    scf.if %11 {
      %c0_10 = arith.constant 0 : index
      %c0_11 = arith.constant 0 : index
      %12 = vector.load %arg7[%c0_10, %c0_11] : memref<16x96xf32, #tpu.memory_space<vmem>>, vector<16x96xf32>
      %c0_12 = arith.constant 0 : index
      %c0_13 = arith.constant 0 : index
      %13 = vector.load %arg5[%c0_12, %c0_13] : memref<1x96xf32, #tpu.memory_space<vmem>>, vector<1x96xf32>
      %14 = vector.broadcast %13 : vector<1x96xf32> to vector<16x96xf32>
      %15 = arith.addf %12, %14 : vector<16x96xf32>
      %c0_14 = arith.constant 0 : index
      %c0_15 = arith.constant 0 : index
      %16 = vector.load %arg6[%c0_14, %c0_15] : memref<16x96xf32, #tpu.memory_space<vmem>>, vector<16x96xf32>
      tpu.vector_store %arg6[%c0_14, %c0_15], %15 {strides = array<i32>} : memref<16x96xf32, #tpu.memory_space<vmem>>, vector<16x96xf32>,
    } else {
    }
    return
  }
  func.func @transform_0(%arg0: i32, %arg1: i32, %arg2: i32) -> (i32, i32) {
    %c0_i32 = arith.constant 0 : i32
    return %arg0, %arg2 : i32, i32
  }
  func.func @transform_1(%arg0: i32, %arg1: i32, %arg2: i32) -> (i32, i32) {
    %c0_i32 = arith.constant 0 : i32
    return %arg2, %arg1 : i32, i32
  }
  func.func @transform_2(%arg0: i32, %arg1: i32, %arg2: i32) -> (i32, i32) {
    %c0_i32 = arith.constant 0 : i32
    %c0_i32_0 = arith.constant 0 : i32
    return %c0_i32, %arg1 : i32, i32
  }
  func.func @transform_3(%arg0: i32, %arg1: i32, %arg2: i32) -> (i32, i32) {
    %c0_i32 = arith.constant 0 : i32
    return %arg0, %arg1 : i32, i32
  }
}

</mosaic_0001>

<bundles_post_ra>
// kernel: tpu_custom_call.1
= control target key start
LH: loop header
LB: loop body
LE: loop exit
PB: predicated region body
PF: predicated region fallthrough
CT: control target
= control target key end

     0   :  { %8 = vsyncpa [#allocation4], 0  ;;  %s365_s0 = inlined_call_operand.hbm [shape: f32[16,32], index: 0, kind: input, shape index: {}]   ;;  %s366_s1 = inlined_call_operand.hbm [shape: f32[32,96], index: 1, kind: input, shape index: {}]   ;;  %s367_s2 = inlined_call_operand.vmem [shape: f32[1,96], index: 2, kind: input, shape index: {}]   ;;  %s368_s3 = inlined_call_operand.hbm [shape: f32[16,96], index: 3, kind: output, shape index: {}]  }
   0x1   :  { %9 = vsyncpa [#allocation7], 0 }
   0x2   :  { %10 = vsyncpa [#allocation5], 0  ;;  %s285_s12 = smov [#allocation3]   ;;  %s213_s16 = scalar_lea.hbm %s365_s0, 256 }
   0x3   :  { %s16_s13 = sshll.u32 %s285_s12, 4  ;;  %p214_p0 = scmp.ne.s32.totalorder %s365_s0, %s213_s16  ;;  %s17_s13 = int_to_ptr.vmem [resolvable:$true] %s16_s13 }
   0x4   :  { %p217_p1 = scmp.lt.u32.totalorder %s213_s16, %s365_s0 }
   0x6   :  { %p219_p2 = pnand %p217_p1, %p214_p0 }
   0x8   :  { %222 = shalt.err (!%p219_p2)
}
   0x9   :  { %s223_s21 = scalar_lea.vmem %s17_s13, 256  ;;  %p228_p4 = scmp.lt.s32.totalorder %s17_s13, %s17_s13 }
   0xa   :  { %p224_p3 = scmp.ne.s32.totalorder %s17_s13, %s223_s21  ;;  %p229_p5 = scmp.lt.s32.totalorder %s223_s21, %s223_s21 }
   0xc   :  { %p230_p6 = por %p229_p5, %p228_p4 }
   0xe   :  { %p231_p7 = pnand %p230_p6, %p224_p3 }
  0x10   :  { %234 = shalt.err (!%p231_p7)
}
  0x11   :  { %s286_s22 = smov 128   ;;  %s287_s23 = smov 8  }
  0x12   :  { %22 = dma.hbm_to_vmem [thread:$0]  %s365_s0, 256, %s17_s13, [#allocation4], %s286_s22, %s286_s22, %s287_s23  }
  0x13   :  { %s288_s26 = smov [#allocation6]   ;;  %s235_s30 = scalar_lea.hbm %s366_s1, 512 }
  0x14   :  { %s28_s27 = sshll.u32 %s288_s26, 4  ;;  %p236_p8 = scmp.ne.s32.totalorder %s366_s1, %s235_s30  ;;  %s29_s27 = int_to_ptr.vmem [resolvable:$true] %s28_s27 }
  0x15   :  { %p239_p9 = scmp.lt.u32.totalorder %s235_s30, %s366_s1 }
  0x17   :  { %p241_p10 = pnand %p239_p9, %p236_p8 }
  0x19   :  { %244 = shalt.err (!%p241_p10)
}
  0x1a   :  { %s245_s8 = scalar_lea.vmem %s29_s27, 512  ;;  %p250_p12 = scmp.lt.s32.totalorder %s29_s27, %s29_s27 }
  0x1b   :  { %p246_p11 = scmp.ne.s32.totalorder %s29_s27, %s245_s8  ;;  %p251_p13 = scmp.lt.s32.totalorder %s245_s8, %s245_s8 }
  0x1d   :  { %p252_p0 = por %p251_p13, %p250_p12 }
  0x1f   :  { %p253_p1 = pnand %p252_p0, %p246_p11 }
  0x21   :  { %256 = shalt.err (!%p253_p1)
}
  0x22   :  { %34 = dma.hbm_to_vmem [thread:$0]  %s366_s1, 512, %s29_s27, [#allocation7], %s286_s22, %s286_s22, %s287_s23  }
  0x23   :  { %279 = dma.done.wait [#allocation4], 256  }
  0x24   :  { %280 = vsyncadd [#allocation4], 4294967040 }
  0x25   :  { %281 = dma.done.wait [#allocation7], 512  }
  0x26   :  { %282 = vsyncadd [#allocation7], 4294966784  ;;  %vm47_vm0 = vcmask 785408   ;;  %v289_v0 = vmov 0.0   ;;  %vm58_vm1 = vcmask 261120   ;;  %v54_v1 = vld [vmem:[#allocation6] sm:$0xff] }
  0x27   :  { %49 = vst.msk [vmem:[#allocation2 + $0x8] sm:$0xff] %vm47_vm0, %v289_v0  ;;  %48 = vst.msk [vmem:[#allocation2] sm:$0xff] %vm47_vm0, %v289_v0  ;;  %v55_v2 = vld [vmem:[#allocation6 + $0x8] sm:$0xff]  ;;  %v56_v3 = vld [vmem:[#allocation6 + $0x10] sm:$0xff]  ;;  %s290_s11 = smov [#allocation8]  }
  0x28   :  { %v199_v4 = vpack.c.bf16 %v55_v2, %v54_v1  ;;  %v57_v5 = vld [vmem:[#allocation6 + $0x18] sm:$0xff]  ;;  %v52_v6 = vld [vmem:[#allocation3] sm:$0xff]  ;;  %v181_v15 = vld [vmem:[%s367_s2] ss:$0 sm:$0xff]  ;;  %s166_s12 = sshll.u32 %s290_s11, 4  ;;  %s167_s12 = int_to_ptr.vmem [resolvable:$true] %s166_s12 }
  0x29   :  { %v203_v7 = vpack.c.bf16 %v57_v5, %v56_v3  ;;  %196 = vmatprep.mubr.msk.f32.mxu0 %vm58_vm1, %v52_v6  ;;  %v53_v8 = vld [vmem:[#allocation3 + $0x8] sm:$0xff]  ;;  %s257_s13 = scalar_lea.vmem %s167_s12, 256  ;;  %p262_p3 = scmp.lt.s32.totalorder %s167_s12, %s167_s12 }
  0x2a   :  { %200 = vmatprep.subr.bf16.mxu0 %v199_v4  ;;  %p258_p2 = scmp.ne.s32.totalorder %s167_s12, %s257_s13  ;;  %p263_p4 = scmp.lt.s32.totalorder %s257_s13, %s257_s13 }
  0x2b   :  { %202 = vmatpush3.bf16.msra.mxu0 %v199_v4 }
  0x2c   :  { %204 = vmatprep.subr.bf16.mxu0 %v203_v7  ;;  %p264_p5 = por %p263_p4, %p262_p3 }
  0x2e   :  { %v51_v9 = vld [vmem:[#allocation2 + $0x8] sm:$0xff]  ;;  %v50_v10 = vld [vmem:[#allocation2] sm:$0xff]  ;;  %p265_p6 = pnand %p264_p5, %p258_p2 }
  0x2f   :  { %206 = vmatpush3.bf16.msra.mxu0 %v203_v7 }
  0x32   :  { %197 = vmatmul.mubr.msk.f32.vlgmr.msra.gmra.mrb[0].mxu0 %vm58_vm1, %v53_v8 }
 0x105   :  { %v198_v11 = vpop.f32.mrb[0].mxu0 }
 0x106   :  { %v141_v12 = vadd.f32 %v198_v11, %v51_v9  ;;  %v131_v13 = vpop.f32.mrb[1].mxu0 }
 0x107   :  { %v140_v14 = vadd.f32 %v131_v13, %v50_v10 }
 0x108   :  { %144 = vst.msk [vmem:[#allocation2 + $0x8] sm:$0xff] %vm47_vm0, %v141_v12 }
 0x109   :  { %143 = vst.msk [vmem:[#allocation2] sm:$0xff] %vm47_vm0, %v140_v14 }
 0x10f   :  { %v149_v16 = vld [vmem:[#allocation2 + $0x8] sm:$0xff] }
 0x110   :  { %v148_v17 = vld [vmem:[#allocation2] sm:$0xff]  ;;  %v158_v18 = vadd.f32 %v181_v15, %v149_v16 }
 0x111   :  { %v157_v19 = vadd.f32 %v181_v15, %v148_v17 }
 0x112   :  { %160 = vst.msk [vmem:[#allocation8 + $0x8] sm:$0xff] %vm47_vm0, %v158_v18 }
 0x113   :  { %159 = vst.msk [vmem:[#allocation8] sm:$0xff] %vm47_vm0, %v157_v19 }
 0x114   :  { %268 = shalt.err (!%p265_p6)
}
 0x115   :  { %s269_s15 = scalar_lea.hbm %s368_s3, 256 }
 0x116   :  { %p270_p7 = scmp.ne.s32.totalorder %s368_s3, %s269_s15  ;;  %p273_p8 = scmp.lt.u32.totalorder %s269_s15, %s368_s3 }
 0x118   :  { %p275_p9 = pnand %p273_p8, %p270_p7 }
 0x11a   :  { %278 = shalt.err (!%p275_p9)
}
 0x11b   :  { %172 = dma.vmem_to_hbm [thread:$0]  %s167_s12, 256, %s368_s3, [#allocation5], %s286_s22, %s286_s22, %s287_s23  }
 0x11c   :  { %283 = dma.done.wait [#allocation5], 256  }
 0x11d   :  { %284 = vsyncadd [#allocation5], 4294967040 }
 0x11e   :  { %176 = vsyncpa [#allocation4], 1 }
 0x11f   :  { %177 = vsyncpa [#allocation7], 1 }
 0x120   :  { %178 = vsyncpa [#allocation5], 1 }

</bundles_post_ra>
